<compile_context>
chip_gen: v5e
topology: v5e:2x2
jax: 0.10.0
libtpu: 0.0.40
codegen_flags: <defaults>
</compile_context>

<pallas_src>
import functools

import jax
import jax.numpy as jnp
from jax.experimental import pallas as pl
from jax.experimental.pallas import tpu as pltpu


def _round_up(x, m):
    return (x + m - 1) // m * m


def _tpu_generation_config():
    """Generation-aware per-step byte target / VMEM budget / VMEM limit."""
    kind = ""
    try:
        kind = jax.devices()[0].device_kind.lower()
    except Exception:  # pragma: no cover - defensive
        pass
    if "v5" in kind:   # v5e: 128 MiB physical VMEM, ~0.82 TB/s HBM
        return dict(step_bytes=2 << 20, input_budget=12 << 20, vmem_limit=32 << 20)
    if "v7" in kind:   # v7x: 64 MiB VMEM per TC, ~3.2 TB/s HBM, 2 TCs
        return dict(step_bytes=8 << 20, input_budget=24 << 20, vmem_limit=48 << 20)
    if "v6" in kind:   # v6e: 128 MiB physical VMEM, ~1.4 TB/s HBM
        return dict(step_bytes=4 << 20, input_budget=48 << 20, vmem_limit=96 << 20)
    # Unknown chip: conservative (fits every generation).
    return dict(step_bytes=4 << 20, input_budget=16 << 20, vmem_limit=40 << 20)


def _dice_partial_kernel(pre_ref, gt_ref, mask_ref, out_ref, *,
                         s_total, ts, blocks_per_part):
    """Accumulates per-row, per-lane partials of a / b / c.

    pre_ref/gt_ref/mask_ref : (B, TS, 128) VMEM tiles (native dtype).
    out_ref                 : (3, B, 128) f32, resident across the reduction
                              ("arbitrary") axis of this partition.
    """
    p = pl.program_id(0)   # parallel partition
    k = pl.program_id(1)   # reduction step within the partition

    @pl.when(k == 0)
    def _init():
        out_ref[...] = jnp.zeros_like(out_ref)

    # Widen in-register; keep all math in f32 (v5e has no bf16 VPU path).
    pre = pre_ref[...].astype(jnp.float32)
    gt = gt_ref[...].astype(jnp.float32)
    mask = mask_ref[...].astype(jnp.float32)

    if s_total % ts != 0:
        # Last block of the global S axis is partial: zero the out-of-range
        # rows (their contents are unspecified, so a pure multiply-by-zero of
        # the mask is not enough if they happen to hold NaN/Inf bit patterns).
        g = p * blocks_per_part + k                       # global block index
        row = g * ts + jax.lax.broadcasted_iota(jnp.int32, (1, ts, 1), 1)
        keep = row < s_total                              # (1, TS, 1)
        pre = jnp.where(keep, pre, 0.0)
        gt = jnp.where(keep, gt, 0.0)
        mask = jnp.where(keep, mask, 0.0)

    pre = pre * mask
    gt = gt * mask

    # Reduce over the TS (sublane) axis only; the 128-lane axis is reduced
    # once, in the wrapper, after the grid finishes.
    out_ref[0, :, :] += jnp.sum(pre * gt, axis=1)         # (B, 128)
    out_ref[1, :, :] += jnp.sum(pre * pre, axis=1)        # (B, 128)
    out_ref[2, :, :] += jnp.sum(gt * gt, axis=1)          # (B, 128)


def dice_loss(pre_score, gt_score, train_mask, eps=1e-6, *, _force_ts=None):
    """Pallas DiceLoss matching the PyTorch module's forward.

    Inputs may be f32 / bf16; train_mask may be f32 / bf16 / int8 / bool.
    They are DMA'd in their native dtype and widened in-register.
    """
    b = pre_score.shape[0]
    pre2d = pre_score.reshape(b, -1)
    gt2d = gt_score.reshape(b, -1)
    mask2d = train_mask.reshape(b, -1)
    l = pre2d.shape[1]

    if mask2d.dtype == jnp.bool_:
        mask2d = mask2d.astype(jnp.int8)

    # Lane-dense layout: (B, L) -> (B, S, 128).  The reshape is free when
    # L % 128 == 0; otherwise pad only the (< 128) trailing columns with zeros
    # (zeros are inert in all three sums).
    # TODO(synk): handle the L % 128 tail fully pad-free via an in-kernel lane
    # mask on the last 128-column, instead of this small jnp.pad.
    l128 = _round_up(l, 128)
    if l128 != l:
        pad = ((0, 0), (0, l128 - l))
        pre2d = jnp.pad(pre2d, pad)
        gt2d = jnp.pad(gt2d, pad)
        mask2d = jnp.pad(mask2d, pad)
    s = l128 // 128
    pre3 = pre2d.reshape(b, s, 128)
    gt3 = gt2d.reshape(b, s, 128)
    mask3 = mask2d.reshape(b, s, 128)

    cfg = _tpu_generation_config()

    # --- auto-size the S-tile (TS) -------------------------------------
    # Bytes one grid step streams from HBM per unit of TS (all three inputs).
    itemsz = (pre3.dtype.itemsize + gt3.dtype.itemsize + mask3.dtype.itemsize)
    per_row_bytes = b * 128 * itemsz
    if _force_ts is not None:
        ts = int(_force_ts)                   # test hook (must be mult. of 8)
    else:
        ts = min(cfg["step_bytes"] // per_row_bytes,          # per-step target
                 cfg["input_budget"] // (2 * per_row_bytes))  # 2x-buffered cap
        ts = max(8, ts)
        if s <= ts:
            ts = s                            # single block (full-dim allowed)
        else:
            ts = max(8, (ts // 16) * 16)      # keep (8,128)-aligned (bf16-safe)

    n_blocks = (s + ts - 1) // ts
    # Optional 2-way split of the block range: feeds both v7x TensorCores via
    # the "parallel" leading grid axis; harmless (sequential) on v5e / v6e.
    p_parts = 2 if (n_blocks >= 2 and n_blocks % 2 == 0) else 1
    k_steps = n_blocks // p_parts

    in_spec = pl.BlockSpec((b, ts, 128), lambda p, k: (0, p * k_steps + k, 0))
    out_spec = pl.BlockSpec((None, 3, b, 128), lambda p, k: (p, 0, 0, 0))

    kernel = functools.partial(_dice_partial_kernel, s_total=s, ts=ts,
                               blocks_per_part=k_steps)

    parts = pl.pallas_call(
        kernel,
        out_shape=jax.ShapeDtypeStruct((p_parts, 3, b, 128), jnp.float32),
        grid_spec=pltpu.PrefetchScalarGridSpec(
            num_scalar_prefetch=0,
            grid=(p_parts, k_steps),
            in_specs=[in_spec, in_spec, in_spec],
            out_specs=out_spec,
        ),
        compiler_params=pltpu.CompilerParams(
            dimension_semantics=("parallel", "arbitrary"),
            vmem_limit_bytes=cfg["vmem_limit"]),
    )(pre3, gt3, mask3)

    # Tiny final combine in plain JAX: cross-partition + cross-lane reduce,
    # then 2a/(b+c), mean over batch, 1 - mean.
    sums = jnp.sum(parts, axis=(0, 3))        # (3, B)
    a = sums[0]
    bb = sums[1] + eps
    c = sums[2] + eps
    d = 2.0 * a / (bb + c)
    return 1.0 - jnp.mean(d)


def _dice_loss_ref(pre_score, gt_score, train_mask, eps):
    # Pure-JAX reference mirroring the PyTorch DiceLoss forward exactly.
    b = pre_score.shape[0]
    mask = train_mask.reshape(b, -1).astype(jnp.float32)
    pre = pre_score.reshape(b, -1).astype(jnp.float32) * mask
    gt = gt_score.reshape(b, -1).astype(jnp.float32) * mask
    a = jnp.sum(pre * gt, axis=1)
    bb = jnp.sum(pre * pre, axis=1) + eps
    c = jnp.sum(gt * gt, axis=1) + eps
    d = 2.0 * a / (bb + c)
    return 1.0 - jnp.mean(d)


if __name__ == "__main__":
    eps = 1e-6

    # --- test 1: module-shaped small input (single block, no masking) ----
    key = jax.random.PRNGKey(0)
    k1, k2, k3 = jax.random.split(key, 3)
    B, H, W = 2, 16, 16
    pre_score = jax.nn.sigmoid(jax.random.normal(k1, (B, H, W), dtype=jnp.float32))
    gt_score = (jax.random.uniform(k2, (B, H, W)) > 0.5).astype(jnp.float32)
    train_mask = (jax.random.uniform(k3, (B, H, W)) > 0.2).astype(jnp.float32)

    loss = dice_loss(pre_score, gt_score, train_mask, eps=eps)
    jax.block_until_ready(loss)
    ref = _dice_loss_ref(pre_score, gt_score, train_mask, eps)
    assert jnp.allclose(loss, ref, atol=1e-5, rtol=1e-5), (loss, ref)

    # --- test 2: multi-block path: tail-row masking + 2-partition combine -
    # S = 9 rows of 128 lanes, forced TS = 8 -> 2 blocks (even => 2 parallel
    # partitions), last block has only 1 valid row (exercises the iota mask).
    k4, k5, k6 = jax.random.split(jax.random.PRNGKey(1), 3)
    B2, S2 = 2, 9
    pre2 = jax.nn.sigmoid(jax.random.normal(k4, (B2, S2, 128), dtype=jnp.float32))
    gt2 = (jax.random.uniform(k5, (B2, S2, 128)) > 0.5).astype(jnp.float32)
    m2 = (jax.random.uniform(k6, (B2, S2, 128)) > 0.2).astype(jnp.float32)
    loss2 = dice_loss(pre2, gt2, m2, eps=eps, _force_ts=8)
    jax.block_until_ready(loss2)
    ref2 = _dice_loss_ref(pre2, gt2, m2, eps)
    assert jnp.allclose(loss2, ref2, atol=1e-5, rtol=1e-5), (loss2, ref2)

    print("KERNEL_OK")
</pallas_src>

<mosaic_0001>
module attributes {stable_mosaic.version = 11 : i64} {
  func.func @_dice_partial_kernel(%arg0: i32, %arg1: i32, %arg2: memref<2x2x128xf32, #tpu.memory_space<vmem>>, %arg3: memref<2x2x128xf32, #tpu.memory_space<vmem>>, %arg4: memref<2x2x128xf32, #tpu.memory_space<vmem>>, %arg5: memref<1x3x2x128xf32, #tpu.memory_space<vmem>>) attributes {dimension_semantics = [#tpu.dimension_semantics<parallel>, #tpu.dimension_semantics<arbitrary>], iteration_bounds = array<i64: 1, 1>, scalar_prefetch = 0 : i64, scratch_operands = 0 : i64, tpu.core_type = #tpu.core_type<tc>, window_params = [{transform_indices = @transform_0, window_bounds = array<i64: 2, 2, 128>}, {transform_indices = @transform_1, window_bounds = array<i64: 2, 2, 128>}, {transform_indices = @transform_2, window_bounds = array<i64: 2, 2, 128>}, {transform_indices = @transform_3, window_bounds = array<i64: 1, 3, 2, 128>}]} {
    %c0_i32 = arith.constant 0 : i32
    %0 = arith.cmpi eq, %arg1, %c0_i32 : i32
    %1 = arith.extui %0 : i1 to i32
    %c0_i32_0 = arith.constant 0 : i32
    %2 = arith.cmpi ne, %1, %c0_i32_0 : i32
    scf.if %2 {
      %cst_33 = arith.constant 0.000000e+00 : f32
      %32 = vector.broadcast %cst_33 : f32 to vector<3x2x128xf32>
      %c0_34 = arith.constant 0 : index
      %c0_35 = arith.constant 0 : index
      %c0_36 = arith.constant 0 : index
      %c0_37 = arith.constant 0 : index
      %33 = vector.load %arg5[%c0_34, %c0_35, %c0_36, %c0_37] : memref<1x3x2x128xf32, #tpu.memory_space<vmem>>, vector<1x3x2x128xf32>
      %34 = vector.shape_cast %33 : vector<1x3x2x128xf32> to vector<3x2x128xf32>
      %35 = vector.shape_cast %32 : vector<3x2x128xf32> to vector<1x3x2x128xf32>
      tpu.vector_store %arg5[%c0_34, %c0_35, %c0_36, %c0_37], %35 {strides = array<i32>} : memref<1x3x2x128xf32, #tpu.memory_space<vmem>>, vector<1x3x2x128xf32>,
    } else {
    }
    %c0 = arith.constant 0 : index
    %c0_1 = arith.constant 0 : index
    %c0_2 = arith.constant 0 : index
    %3 = vector.load %arg2[%c0, %c0_1, %c0_2] : memref<2x2x128xf32, #tpu.memory_space<vmem>>, vector<2x2x128xf32>
    %c0_3 = arith.constant 0 : index
    %c0_4 = arith.constant 0 : index
    %c0_5 = arith.constant 0 : index
    %4 = vector.load %arg3[%c0_3, %c0_4, %c0_5] : memref<2x2x128xf32, #tpu.memory_space<vmem>>, vector<2x2x128xf32>
    %c0_6 = arith.constant 0 : index
    %c0_7 = arith.constant 0 : index
    %c0_8 = arith.constant 0 : index
    %5 = vector.load %arg4[%c0_6, %c0_7, %c0_8] : memref<2x2x128xf32, #tpu.memory_space<vmem>>, vector<2x2x128xf32>
    %6 = arith.mulf %3, %5 : vector<2x2x128xf32>
    %7 = arith.mulf %4, %5 : vector<2x2x128xf32>
    %c0_9 = arith.constant 0 : index
    %c0_10 = arith.constant 0 : index
    %c0_11 = arith.constant 0 : index
    %c0_12 = arith.constant 0 : index
    %8 = vector.load %arg5[%c0_9, %c0_10, %c0_11, %c0_12] : memref<1x3x2x128xf32, #tpu.memory_space<vmem>>, vector<1x1x2x128xf32>
    %9 = vector.shape_cast %8 : vector<1x1x2x128xf32> to vector<2x128xf32>
    %10 = arith.mulf %6, %7 : vector<2x2x128xf32>
    %cst = arith.constant dense<0.000000e+00> : vector<2x128xf32>
    %11 = vector.multi_reduction <add>, %10, %cst [1] : vector<2x2x128xf32> to vector<2x128xf32>
    %12 = arith.addf %9, %11 : vector<2x128xf32>
    %c0_13 = arith.constant 0 : index
    %c0_14 = arith.constant 0 : index
    %c0_15 = arith.constant 0 : index
    %c0_16 = arith.constant 0 : index
    %13 = vector.load %arg5[%c0_13, %c0_14, %c0_15, %c0_16] : memref<1x3x2x128xf32, #tpu.memory_space<vmem>>, vector<1x1x2x128xf32>
    %14 = vector.shape_cast %13 : vector<1x1x2x128xf32> to vector<2x128xf32>
    %15 = vector.shape_cast %12 : vector<2x128xf32> to vector<1x1x2x128xf32>
    tpu.vector_store %arg5[%c0_13, %c0_14, %c0_15, %c0_16], %15 {strides = array<i32>} : memref<1x3x2x128xf32, #tpu.memory_space<vmem>>, vector<1x1x2x128xf32>,
    %c0_17 = arith.constant 0 : index
    %c1 = arith.constant 1 : index
    %c0_18 = arith.constant 0 : index
    %c0_19 = arith.constant 0 : index
    %16 = vector.load %arg5[%c0_17, %c1, %c0_18, %c0_19] : memref<1x3x2x128xf32, #tpu.memory_space<vmem>>, vector<1x1x2x128xf32>
    %17 = vector.shape_cast %16 : vector<1x1x2x128xf32> to vector<2x128xf32>
    %18 = arith.mulf %6, %6 : vector<2x2x128xf32>
    %cst_20 = arith.constant dense<0.000000e+00> : vector<2x128xf32>
    %19 = vector.multi_reduction <add>, %18, %cst_20 [1] : vector<2x2x128xf32> to vector<2x128xf32>
    %20 = arith.addf %17, %19 : vector<2x128xf32>
    %c0_21 = arith.constant 0 : index
    %c1_22 = arith.constant 1 : index
    %c0_23 = arith.constant 0 : index
    %c0_24 = arith.constant 0 : index
    %21 = vector.load %arg5[%c0_21, %c1_22, %c0_23, %c0_24] : memref<1x3x2x128xf32, #tpu.memory_space<vmem>>, vector<1x1x2x128xf32>
    %22 = vector.shape_cast %21 : vector<1x1x2x128xf32> to vector<2x128xf32>
    %23 = vector.shape_cast %20 : vector<2x128xf32> to vector<1x1x2x128xf32>
    tpu.vector_store %arg5[%c0_21, %c1_22, %c0_23, %c0_24], %23 {strides = array<i32>} : memref<1x3x2x128xf32, #tpu.memory_space<vmem>>, vector<1x1x2x128xf32>,
    %c0_25 = arith.constant 0 : index
    %c2 = arith.constant 2 : index
    %c0_26 = arith.constant 0 : index
    %c0_27 = arith.constant 0 : index
    %24 = vector.load %arg5[%c0_25, %c2, %c0_26, %c0_27] : memref<1x3x2x128xf32, #tpu.memory_space<vmem>>, vector<1x1x2x128xf32>
    %25 = vector.shape_cast %24 : vector<1x1x2x128xf32> to vector<2x128xf32>
    %26 = arith.mulf %7, %7 : vector<2x2x128xf32>
    %cst_28 = arith.constant dense<0.000000e+00> : vector<2x128xf32>
    %27 = vector.multi_reduction <add>, %26, %cst_28 [1] : vector<2x2x128xf32> to vector<2x128xf32>
    %28 = arith.addf %25, %27 : vector<2x128xf32>
    %c0_29 = arith.constant 0 : index
    %c2_30 = arith.constant 2 : index
    %c0_31 = arith.constant 0 : index
    %c0_32 = arith.constant 0 : index
    %29 = vector.load %arg5[%c0_29, %c2_30, %c0_31, %c0_32] : memref<1x3x2x128xf32, #tpu.memory_space<vmem>>, vector<1x1x2x128xf32>
    %30 = vector.shape_cast %29 : vector<1x1x2x128xf32> to vector<2x128xf32>
    %31 = vector.shape_cast %28 : vector<2x128xf32> to vector<1x1x2x128xf32>
    tpu.vector_store %arg5[%c0_29, %c2_30, %c0_31, %c0_32], %31 {strides = array<i32>} : memref<1x3x2x128xf32, #tpu.memory_space<vmem>>, vector<1x1x2x128xf32>,
    return
  }
  func.func @transform_0(%arg0: i32, %arg1: i32) -> (i32, i32, i32) {
    %c1_i32 = arith.constant 1 : i32
    %0 = arith.muli %arg0, %c1_i32 : i32
    %1 = arith.addi %0, %arg1 : i32
    %c0_i32 = arith.constant 0 : i32
    %c0_i32_0 = arith.constant 0 : i32
    %c0_i32_1 = arith.constant 0 : i32
    return %c0_i32, %1, %c0_i32_0 : i32, i32, i32
  }
  func.func @transform_1(%arg0: i32, %arg1: i32) -> (i32, i32, i32) {
    %c1_i32 = arith.constant 1 : i32
    %0 = arith.muli %arg0, %c1_i32 : i32
    %1 = arith.addi %0, %arg1 : i32
    %c0_i32 = arith.constant 0 : i32
    %c0_i32_0 = arith.constant 0 : i32
    %c0_i32_1 = arith.constant 0 : i32
    return %c0_i32, %1, %c0_i32_0 : i32, i32, i32
  }
  func.func @transform_2(%arg0: i32, %arg1: i32) -> (i32, i32, i32) {
    %c1_i32 = arith.constant 1 : i32
    %0 = arith.muli %arg0, %c1_i32 : i32
    %1 = arith.addi %0, %arg1 : i32
    %c0_i32 = arith.constant 0 : i32
    %c0_i32_0 = arith.constant 0 : i32
    %c0_i32_1 = arith.constant 0 : i32
    return %c0_i32, %1, %c0_i32_0 : i32, i32, i32
  }
  func.func @transform_3(%arg0: i32, %arg1: i32) -> (i32, i32, i32, i32) {
    %c0_i32 = arith.constant 0 : i32
    %c0_i32_0 = arith.constant 0 : i32
    %c0_i32_1 = arith.constant 0 : i32
    %c0_i32_2 = arith.constant 0 : i32
    return %arg0, %c0_i32, %c0_i32_0, %c0_i32_1 : i32, i32, i32, i32
  }
}

</mosaic_0001>

<bundles_post_ra>
// kernel: tpu_custom_call.1
= control target key start
LH: loop header
LB: loop body
LE: loop exit
PB: predicated region body
PF: predicated region fallthrough
CT: control target
= control target key end

     0   :  { %8 = vsyncpa [#allocation3], 0  ;;  %s353_s0 = inlined_call_operand.hbm [shape: f32[2,2,128], index: 0, kind: input, shape index: {}]   ;;  %s354_s1 = inlined_call_operand.hbm [shape: f32[2,2,128], index: 1, kind: input, shape index: {}]   ;;  %s355_s2 = inlined_call_operand.hbm [shape: f32[2,2,128], index: 2, kind: input, shape index: {}]   ;;  %s356_s3 = inlined_call_operand.hbm [shape: f32[1,3,2,128], index: 3, kind: output, shape index: {}]  }
   0x1   :  { %9 = vsyncpa [#allocation6], 0 }
   0x2   :  { %10 = vsyncpa [#allocation4], 0  ;;  %s34_s14 = sshll.u32 %s354_s1, 4  ;;  %s293_s15 = smov [#allocation5]   ;;  %s35_s14 = int_to_ptr.hbm [resolvable:$true] %s34_s14 }
   0x3   :  { %s36_s16 = sshll.u32 %s293_s15, 4  ;;  %s18_s19 = sshll.u32 %s353_s0, 4  ;;  %s37_s16 = int_to_ptr.vmem [resolvable:$true] %s36_s16  ;;  %s19_s19 = int_to_ptr.hbm [resolvable:$true] %s18_s19 }
   0x4   :  { %s294_s20 = smov 32   ;;  %s295_s21 = smov 2  }
   0x5   :  { %42 = dma.hbm_to_vmem [thread:$0]  %s35_s14, 64, %s37_s16, [#allocation6], %s294_s20, %s294_s20, %s295_s21  }
   0x6   :  { %s296_s22 = smov [#allocation2]   ;;  %s50_s1 = sshll.u32 %s355_s2, 4  ;;  %s51_s1 = int_to_ptr.hbm [resolvable:$true] %s50_s1 }
   0x7   :  { %s20_s23 = sshll.u32 %s296_s22, 4  ;;  %s297_s0 = smov [#allocation7]   ;;  %s21_s23 = int_to_ptr.vmem [resolvable:$true] %s20_s23 }
   0x8   :  { %26 = dma.hbm_to_vmem [thread:$0]  %s19_s19, 64, %s21_s23, [#allocation3], %s294_s20, %s294_s20, %s295_s21  }
   0x9   :  { %s52_s26 = sshll.u32 %s297_s0, 4  ;;  %s53_s26 = int_to_ptr.vmem [resolvable:$true] %s52_s26 }
   0xa   :  { %58 = dma.hbm_to_vmem [thread:$0]  %s51_s1, 64, %s53_s26, [#allocation6], %s294_s20, %s294_s20, %s295_s21  }
   0xb   :  { %287 = dma.done.wait [#allocation3], 64  }
   0xc   :  { %288 = vsyncadd [#allocation3], 4294967232 }
   0xd   :  { %289 = dma.done.wait [#allocation6], 128  }
   0xe   :  { %290 = vsyncadd [#allocation6], 4294967168  ;;  %v298_v0 = vmov 0.0   ;;  %v81_v1 = vld [vmem:[#allocation2] sm:$0x3]  ;;  %vm94_vm0 = vcmask 1041408  }
   0xf   :  { %78 = vst [vmem:[#allocation8] sm:$0x3] %v298_v0  ;;  %v82_v2 = vld [vmem:[#allocation2 + $0x2] sm:$0x3]  ;;  %v83_v3 = vld [vmem:[#allocation5] sm:$0x3] }
  0x10   :  { %79 = vst [vmem:[#allocation8 + $0x2] sm:$0x3] %v298_v0  ;;  %v84_v4 = vld [vmem:[#allocation5 + $0x2] sm:$0x3]  ;;  %v85_v5 = vld [vmem:[#allocation7] sm:$0x3] }
  0x11   :  { %80 = vst [vmem:[#allocation8 + $0x4] sm:$0x3] %v298_v0  ;;  %v86_v6 = vld [vmem:[#allocation7 + $0x2] sm:$0x3]  ;;  %v87_v7 = vmul.f32 %v85_v5, %v81_v1  ;;  %v89_v9 = vmul.f32 %v85_v5, %v83_v3  ;;  %vm111_vm1 = vcmask 1041409   ;;  %s299_s2 = smov [#allocation8]  }
  0x12   :  { %v88_v8 = vmul.f32 %v86_v6, %v82_v2  ;;  %v90_v10 = vmul.f32 %v86_v6, %v84_v4  ;;  %s168_s27 = sshll.u32 %s299_s2, 4  ;;  %s170_s30 = sshll.u32 %s356_s3, 4  ;;  %s169_s27 = int_to_ptr.vmem [resolvable:$true] %s168_s27  ;;  %s171_s30 = int_to_ptr.hbm [resolvable:$true] %s170_s30 }
  0x13   :  { %v92_v11 = vmul.f32 %v89_v9, %v87_v7  ;;  %v118_v13 = vmul.f32 %v87_v7, %v87_v7  ;;  %v142_v15 = vmul.f32 %v89_v9, %v89_v9 }
  0x14   :  { %v93_v12 = vmul.f32 %v90_v10, %v88_v8  ;;  %v119_v14 = vmul.f32 %v88_v8, %v88_v8  ;;  %v143_v16 = vmul.f32 %v90_v10, %v90_v10 }
  0x15   :  { %v95_v17 = vsel %vm94_vm0, %v92_v11, 0.0  ;;  %v120_v19 = vsel %vm94_vm0, %v118_v13, 0.0  ;;  %v144_v25 = vsel %vm94_vm0, %v142_v15, 0.0 }
  0x16   :  { %v102_v18 = vsel %vm94_vm0, %v93_v12, 0.0  ;;  %v127_v20 = vsel %vm94_vm0, %v119_v14, 0.0  ;;  %v96_v21 = vrot.slane %v95_v17, 4  ;;  %v121_v23 = vrot.slane %v120_v19, 4  ;;  %v91_v51 = vld [vmem:[#allocation8] sm:$0x3] }
  0x17   :  { %v103_v22 = vrot.slane %v102_v18, 4  ;;  %v128_v24 = vrot.slane %v127_v20, 4  ;;  %v151_v26 = vsel %vm94_vm0, %v143_v16, 0.0  ;;  %v145_v31 = vrot.slane %v144_v25, 4  ;;  %v117_v54 = vld [vmem:[#allocation8 + $0x2] sm:$0x3] }
  0x18   :  { %v97_v27 = vadd.f32 %v96_v21, %v95_v17  ;;  %v122_v29 = vadd.f32 %v121_v23, %v120_v19  ;;  %v152_v32 = vrot.slane %v151_v26, 4  ;;  %v141_v63 = vld [vmem:[#allocation8 + $0x4] sm:$0x3] }
  0x19   :  { %v104_v28 = vadd.f32 %v103_v22, %v102_v18  ;;  %v129_v30 = vadd.f32 %v128_v24, %v127_v20  ;;  %v146_v37 = vadd.f32 %v145_v31, %v144_v25 }
  0x1a   :  { %v98_v33 = vrot.slane %v97_v27, 2  ;;  %v123_v35 = vrot.slane %v122_v29, 2  ;;  %v153_v38 = vadd.f32 %v152_v32, %v151_v26 }
  0x1b   :  { %v105_v34 = vrot.slane %v104_v28, 2  ;;  %v130_v36 = vrot.slane %v129_v30, 2  ;;  %v147_v43 = vrot.slane %v146_v37, 2 }
  0x1c   :  { %v99_v39 = vadd.f32 %v98_v33, %v97_v27  ;;  %v124_v41 = vadd.f32 %v123_v35, %v122_v29  ;;  %v154_v44 = vrot.slane %v153_v38, 2 }
  0x1d   :  { %v106_v40 = vadd.f32 %v105_v34, %v104_v28  ;;  %v131_v42 = vadd.f32 %v130_v36, %v129_v30  ;;  %v148_v49 = vadd.f32 %v147_v43, %v146_v37 }
  0x1e   :  { %v100_v45 = vrot.slane %v99_v39, 1  ;;  %v125_v47 = vrot.slane %v124_v41, 1  ;;  %v155_v50 = vadd.f32 %v154_v44, %v153_v38 }
  0x1f   :  { %v107_v46 = vrot.slane %v106_v40, 1  ;;  %v132_v48 = vrot.slane %v131_v42, 1  ;;  %v149_v57 = vrot.slane %v148_v49, 1 }
  0x20   :  { %v101_v52 = vadd.f32 %v100_v45, %v99_v39  ;;  %v126_v55 = vadd.f32 %v125_v47, %v124_v41  ;;  %v156_v58 = vrot.slane %v155_v50, 1 }
  0x21   :  { %v108_v53 = vadd.f32 %v107_v46, %v106_v40  ;;  %v133_v56 = vadd.f32 %v132_v48, %v131_v42  ;;  %v150_v0 = vadd.f32 %v149_v57, %v148_v49 }
  0x22   :  { %v157_v1 = vadd.f32 %v156_v58, %v155_v50 }
  0x23   :  { %v112_v59 = vsel %vm111_vm1, %v108_v53, %v101_v52  ;;  %v136_v60 = vsel %vm111_vm1, %v133_v56, %v126_v55 }
  0x24   :  { %v114_v61 = vadd.f32 %v112_v59, %v91_v51  ;;  %v138_v62 = vadd.f32 %v136_v60, %v117_v54  ;;  %v160_v2 = vsel %vm111_vm1, %v157_v1, %v150_v0 }
  0x25   :  { %v162_v3 = vadd.f32 %v160_v2, %v141_v63 }
  0x26   :  { %115 = vst [vmem:[#allocation8] sm:$0x3] %v114_v61 }
  0x27   :  { %139 = vst [vmem:[#allocation8 + $0x2] sm:$0x3] %v138_v62 }
  0x28   :  { %163 = vst [vmem:[#allocation8 + $0x4] sm:$0x3] %v162_v3 }
  0x29   :  { %176 = dma.vmem_to_hbm [thread:$0]  %s169_s27, 96, %s171_s30, [#allocation4], %s294_s20, %s294_s20, %s295_s21  }
  0x2a   :  { %291 = dma.done.wait [#allocation4], 96  }
  0x2b   :  { %292 = vsyncadd [#allocation4], 4294967200 }
  0x2c   :  { %181 = vsyncpa [#allocation3], 1 }
  0x2d   :  { %182 = vsyncpa [#allocation6], 1 }
  0x2e   :  { %183 = vsyncpa [#allocation4], 1 }

</bundles_post_ra>
